<compile_context>
chip_gen: v5e
topology: v5e:2x2
jax: 0.10.0
libtpu: 0.0.40
codegen_flags: <defaults>
</compile_context>

<pallas_src>
import functools
import math

import jax
import jax.numpy as jnp
from jax.experimental import pallas as pl
from jax.experimental.pallas import tpu as pltpu


def _round_up(n, m):
    return ((n + m - 1) // m) * m


def _default_act_dtype():
    """bf16 matmul/tanh path on v6e/v7x (bf16 VPU/EUP); keep f32 on v5e and older."""
    try:
        kind = jax.devices()[0].device_kind.lower()
    except Exception:
        return jnp.float32
    for old in ("v2", "v3", "v4", "v5"):
        if old in kind:
            return jnp.float32
    return jnp.bfloat16


def _num_tensorcores():
    """Best-effort TensorCore count per device (v7x / megacore chips expose 2)."""
    try:
        dev = jax.devices()[0]
        nc = getattr(dev, "num_cores", None)
        if isinstance(nc, int) and nc > 0:
            return nc
        kind = dev.device_kind.lower()
        return 2 if ("v7" in kind or "v4" in kind or "v5p" in kind) else 1
    except Exception:
        return 1


# ---------------------------------------------------------------------------
# Kernel: whole encoder+decoder MLP for one feature-major batch tile.
#   x_ref  : (dim, blk)     feature-major input tile (no feature padding)
#   w_ref  : (L, MF, MF)    zero-padded weight stack, torch layout (out, in)
#   b_ref  : (L, MF, 1)     zero-padded bias stack (f32)
#   out_ref: (dim, blk)     feature-major output tile
# All layer sizes are static, so every dot uses the exact (out_l, in_l) weight slice.
# ---------------------------------------------------------------------------
def autoencoder_kernel(x_ref, w_ref, b_ref, out_ref, *, sizes, tanh_layers, act_dtype):
    n_layers = len(sizes) - 1
    h = x_ref[...].astype(act_dtype)                          # (dim, blk)
    for layer in range(n_layers):                             # static unroll: 6 tiny layers
        in_l, out_l = sizes[layer], sizes[layer + 1]
        w = w_ref[layer, :out_l, :in_l].astype(act_dtype)     # exact slice -> no padded MXU work
        y = jnp.dot(w, h, preferred_element_type=jnp.float32) + b_ref[layer, :out_l, :]
        if layer == n_layers - 1:                             # final linear, no activation
            out_ref[...] = y.astype(out_ref.dtype)
        elif layer in tanh_layers:                            # Tanh layers (EUP)
            h = jnp.tanh(y.astype(act_dtype))
        else:                                                 # bottleneck z, no activation
            h = y.astype(act_dtype)


# ---------------------------------------------------------------------------
# Parameter helpers (PyTorch-Linear-style layout and init).
# ---------------------------------------------------------------------------
def init_params(key, dim, theta, dtype=jnp.float32):
    """Torch-style Linear params: w is (out_features, in_features), b is (out_features,)."""
    sizes = [dim + theta * k for k in (0, 1, 2, 3, 2, 1, 0)]
    params = []
    for i in range(6):
        fan_in, fan_out = sizes[i], sizes[i + 1]
        key, kw, kb = jax.random.split(key, 3)
        bound = 1.0 / math.sqrt(fan_in)
        w = jax.random.uniform(kw, (fan_out, fan_in), dtype, -bound, bound)
        b = jax.random.uniform(kb, (fan_out,), dtype, -bound, bound)
        params.append((w, b))
    return params


def pack_params(params, *, dtype=jnp.float32):
    """Pack the (w, b) pairs into zero-padded stacks (L, MF, MF) and (L, MF, 1)."""
    sizes = (params[0][0].shape[1],) + tuple(w.shape[0] for w, _ in params)
    mf = max(_round_up(max(sizes), 8), 8)
    ws, bs = [], []
    for w, b in params:
        wp = jnp.zeros((mf, mf), dtype).at[: w.shape[0], : w.shape[1]].set(w.astype(dtype))
        bp = jnp.zeros((mf, 1), jnp.float32).at[: b.shape[0], 0].set(b.astype(jnp.float32))
        ws.append(wp)
        bs.append(bp)
    return jnp.stack(ws), jnp.stack(bs), sizes, mf


# ---------------------------------------------------------------------------
# Forward wrapper (equivalent of Autoencoder.forward).
# ---------------------------------------------------------------------------
def autoencoder_forward(x, params, dim, *, block_b=4096, act_dtype=None):
    if act_dtype is None:
        act_dtype = _default_act_dtype()

    x2d = x.reshape(-1, dim)
    batch = x2d.shape[0]

    n_layers = len(params)
    w_all, b_all, sizes, mf = pack_params(params, dtype=act_dtype)
    assert sizes[0] == dim and sizes[-1] == dim, "first/last layer width must equal dim"

    # Lane-dense batch tile: multiple of 128 (and of 256 when large, for the v6e/v7x MXU N-tile).
    blk = min(block_b, _round_up(max(batch, 1), 128))
    blk = max(blk, 128)
    # Split a single-tile grid into 2 steps only when >= 2 TensorCores can use them (v7x/megacore).
    if _num_tensorcores() >= 2 and _round_up(batch, blk) // blk == 1 and blk > 128:
        blk = _round_up(blk // 2, 128)
    batch_pad = _round_up(batch, blk)
    grid = (batch_pad // blk,)

    # Feature-major input: (dim, batch_pad) in act_dtype. Only the true `dim` feature rows are
    # shipped (no padding to mf); transpose + cast + pad happen in a single wrapper pass.
    xt = x2d.T.astype(act_dtype)
    if batch_pad == batch:
        x_t = xt
    else:
        x_t = jnp.zeros((dim, batch_pad), act_dtype).at[:, :batch].set(xt)

    kernel = functools.partial(
        autoencoder_kernel,
        sizes=sizes,
        tanh_layers=(0, 1, 3, 4),   # Tanh after encoder layers 0,1 and decoder layers 3,4
        act_dtype=act_dtype,
    )
    out_t = pl.pallas_call(
        kernel,
        out_shape=jax.ShapeDtypeStruct((dim, batch_pad), jnp.float32),
        grid_spec=pltpu.PrefetchScalarGridSpec(
            num_scalar_prefetch=0,
            grid=grid,
            in_specs=[
                pl.BlockSpec((dim, blk), lambda i: (0, i)),              # unpadded input tile
                pl.BlockSpec((n_layers, mf, mf), lambda i: (0, 0, 0)),   # grid-invariant weights
                pl.BlockSpec((n_layers, mf, 1), lambda i: (0, 0, 0)),    # grid-invariant biases
            ],
            out_specs=pl.BlockSpec((dim, blk), lambda i: (0, i)),
        ),
        compiler_params=pltpu.CompilerParams(
            dimension_semantics=("parallel",),
            # 32 MiB is generous for this kernel (< a few MiB/step even at blk=4096) and safe
            # on v7x's 64 MiB VMEM; also raises v5e's 16 MiB scoped default.
            vmem_limit_bytes=32 * 1024 * 1024,
        ),
    )(x_t, w_all, b_all)

    return out_t[:, :batch].T.reshape(-1, dim)


# ---------------------------------------------------------------------------
# Pure-JAX reference for correctness checking.
# ---------------------------------------------------------------------------
def reference_forward(x, params, dim):
    h = x.reshape(-1, dim).astype(jnp.float32)
    for layer, (w, b) in enumerate(params):
        h = h @ w.T.astype(jnp.float32) + b.astype(jnp.float32)
        if layer in (0, 1, 3, 4):
            h = jnp.tanh(h)
    return h.reshape(-1, dim)


if __name__ == "__main__":
    dim, theta = 16, 8
    key = jax.random.PRNGKey(0)
    kx1, kx2, kp = jax.random.split(key, 3)
    params = init_params(kp, dim, theta)

    # Case 1: aligned batch (forward views (4, 4, 16) as (16, 16)), default activation dtype
    # (bf16 matmul/tanh path on v6e/v7x, f32 on v5e and older).
    default_act = _default_act_dtype()
    tol1 = 5e-2 if default_act == jnp.bfloat16 else 1e-4
    x1 = jax.random.normal(kx1, (4, 4, dim), dtype=jnp.float32)
    out1 = jax.block_until_ready(autoencoder_forward(x1, params, dim))
    ref1 = reference_forward(x1, params, dim)
    assert out1.shape == (16, dim)
    assert jnp.allclose(out1, ref1, atol=tol1, rtol=tol1), "mismatch vs reference (case 1)"

    # Case 2: batch (18) not a multiple of the tile (exercises wrapper-side padding) with the
    # f32 path explicitly forced (callers can demand f32-faithful outputs).
    x2 = jax.random.normal(kx2, (3, 6, dim), dtype=jnp.float32)
    out2 = jax.block_until_ready(
        autoencoder_forward(x2, params, dim, act_dtype=jnp.float32))
    ref2 = reference_forward(x2, params, dim)
    assert out2.shape == (18, dim)
    assert jnp.allclose(out2, ref2, atol=1e-4, rtol=1e-4), "mismatch vs reference (case 2)"

    print("KERNEL_OK")
</pallas_src>

<mosaic_0001>
module attributes {stable_mosaic.version = 11 : i64} {
  func.func @autoencoder_kernel(%arg0: i32, %arg1: memref<16x128xbf16, #tpu.memory_space<vmem>>, %arg2: memref<6x40x40xbf16, #tpu.memory_space<vmem>>, %arg3: memref<6x40x1xf32, #tpu.memory_space<vmem>>, %arg4: memref<16x128xf32, #tpu.memory_space<vmem>>) attributes {dimension_semantics = [#tpu.dimension_semantics<parallel>], iteration_bounds = array<i64: 1>, scalar_prefetch = 0 : i64, scratch_operands = 0 : i64, tpu.core_type = #tpu.core_type<tc>, window_params = [{transform_indices = @transform_0, window_bounds = array<i64: 16, 128>}, {pipeline_mode = #tpu.pipeline_mode<synchronous>, transform_indices = @transform_1, window_bounds = array<i64: 6, 40, 40>}, {pipeline_mode = #tpu.pipeline_mode<synchronous>, transform_indices = @transform_2, window_bounds = array<i64: 6, 40, 1>}, {transform_indices = @transform_3, window_bounds = array<i64: 16, 128>}]} {
    %c0 = arith.constant 0 : index
    %c0_0 = arith.constant 0 : index
    %0 = vector.load %arg1[%c0, %c0_0] : memref<16x128xbf16, #tpu.memory_space<vmem>>, vector<16x128xbf16>
    %c0_1 = arith.constant 0 : index
    %c0_2 = arith.constant 0 : index
    %c0_3 = arith.constant 0 : index
    %1 = vector.load %arg2[%c0_1, %c0_2, %c0_3] : memref<6x40x40xbf16, #tpu.memory_space<vmem>>, vector<1x24x16xbf16>
    %2 = vector.shape_cast %1 : vector<1x24x16xbf16> to vector<24x16xbf16>
    %cst = arith.constant dense<0.000000e+00> : vector<24x128xf32>
    %3 = tpu.matmul %2, %0, %cst {dimension_numbers = #tpu.dot_dimension_numbers<[1], [0], [0], [1], [0, 0, 1, 1], [], []>} : vector<24x16xbf16>, vector<16x128xbf16>, vector<24x128xf32> -> vector<24x128xf32>
    %c0_4 = arith.constant 0 : index
    %c0_5 = arith.constant 0 : index
    %c0_6 = arith.constant 0 : index
    %4 = vector.load %arg3[%c0_4, %c0_5, %c0_6] : memref<6x40x1xf32, #tpu.memory_space<vmem>>, vector<1x24x1xf32>
    %5 = vector.shape_cast %4 : vector<1x24x1xf32> to vector<24x1xf32>
    %6 = vector.broadcast %5 : vector<24x1xf32> to vector<24x128xf32>
    %7 = arith.addf %3, %6 : vector<24x128xf32>
    %8 = arith.truncf %7 : vector<24x128xf32> to vector<24x128xbf16>
    %9 = math.tanh %8 : vector<24x128xbf16>
    %c1 = arith.constant 1 : index
    %c0_7 = arith.constant 0 : index
    %c0_8 = arith.constant 0 : index
    %10 = vector.load %arg2[%c1, %c0_7, %c0_8] : memref<6x40x40xbf16, #tpu.memory_space<vmem>>, vector<1x32x24xbf16>
    %11 = vector.shape_cast %10 : vector<1x32x24xbf16> to vector<32x24xbf16>
    %cst_9 = arith.constant dense<0.000000e+00> : vector<32x128xf32>
    %12 = tpu.matmul %11, %9, %cst_9 {dimension_numbers = #tpu.dot_dimension_numbers<[1], [0], [0], [1], [0, 0, 1, 1], [], []>} : vector<32x24xbf16>, vector<24x128xbf16>, vector<32x128xf32> -> vector<32x128xf32>
    %c1_10 = arith.constant 1 : index
    %c0_11 = arith.constant 0 : index
    %c0_12 = arith.constant 0 : index
    %13 = vector.load %arg3[%c1_10, %c0_11, %c0_12] : memref<6x40x1xf32, #tpu.memory_space<vmem>>, vector<1x32x1xf32>
    %14 = vector.shape_cast %13 : vector<1x32x1xf32> to vector<32x1xf32>
    %15 = vector.broadcast %14 : vector<32x1xf32> to vector<32x128xf32>
    %16 = arith.addf %12, %15 : vector<32x128xf32>
    %17 = arith.truncf %16 : vector<32x128xf32> to vector<32x128xbf16>
    %18 = math.tanh %17 : vector<32x128xbf16>
    %c2 = arith.constant 2 : index
    %c0_13 = arith.constant 0 : index
    %c0_14 = arith.constant 0 : index
    %19 = vector.load %arg2[%c2, %c0_13, %c0_14] : memref<6x40x40xbf16, #tpu.memory_space<vmem>>, vector<1x40x32xbf16>
    %20 = vector.shape_cast %19 : vector<1x40x32xbf16> to vector<40x32xbf16>
    %cst_15 = arith.constant dense<0.000000e+00> : vector<40x128xf32>
    %21 = tpu.matmul %20, %18, %cst_15 {dimension_numbers = #tpu.dot_dimension_numbers<[1], [0], [0], [1], [0, 0, 1, 1], [], []>} : vector<40x32xbf16>, vector<32x128xbf16>, vector<40x128xf32> -> vector<40x128xf32>
    %c2_16 = arith.constant 2 : index
    %c0_17 = arith.constant 0 : index
    %c0_18 = arith.constant 0 : index
    %22 = vector.load %arg3[%c2_16, %c0_17, %c0_18] : memref<6x40x1xf32, #tpu.memory_space<vmem>>, vector<1x40x1xf32>
    %23 = vector.shape_cast %22 : vector<1x40x1xf32> to vector<40x1xf32>
    %24 = vector.broadcast %23 : vector<40x1xf32> to vector<40x128xf32>
    %25 = arith.addf %21, %24 : vector<40x128xf32>
    %26 = arith.truncf %25 : vector<40x128xf32> to vector<40x128xbf16>
    %c3 = arith.constant 3 : index
    %c0_19 = arith.constant 0 : index
    %c0_20 = arith.constant 0 : index
    %27 = vector.load %arg2[%c3, %c0_19, %c0_20] : memref<6x40x40xbf16, #tpu.memory_space<vmem>>, vector<1x32x40xbf16>
    %28 = vector.shape_cast %27 : vector<1x32x40xbf16> to vector<32x40xbf16>
    %cst_21 = arith.constant dense<0.000000e+00> : vector<32x128xf32>
    %29 = tpu.matmul %28, %26, %cst_21 {dimension_numbers = #tpu.dot_dimension_numbers<[1], [0], [0], [1], [0, 0, 1, 1], [], []>} : vector<32x40xbf16>, vector<40x128xbf16>, vector<32x128xf32> -> vector<32x128xf32>
    %c3_22 = arith.constant 3 : index
    %c0_23 = arith.constant 0 : index
    %c0_24 = arith.constant 0 : index
    %30 = vector.load %arg3[%c3_22, %c0_23, %c0_24] : memref<6x40x1xf32, #tpu.memory_space<vmem>>, vector<1x32x1xf32>
    %31 = vector.shape_cast %30 : vector<1x32x1xf32> to vector<32x1xf32>
    %32 = vector.broadcast %31 : vector<32x1xf32> to vector<32x128xf32>
    %33 = arith.addf %29, %32 : vector<32x128xf32>
    %34 = arith.truncf %33 : vector<32x128xf32> to vector<32x128xbf16>
    %35 = math.tanh %34 : vector<32x128xbf16>
    %c4 = arith.constant 4 : index
    %c0_25 = arith.constant 0 : index
    %c0_26 = arith.constant 0 : index
    %36 = vector.load %arg2[%c4, %c0_25, %c0_26] : memref<6x40x40xbf16, #tpu.memory_space<vmem>>, vector<1x24x32xbf16>
    %37 = vector.shape_cast %36 : vector<1x24x32xbf16> to vector<24x32xbf16>
    %cst_27 = arith.constant dense<0.000000e+00> : vector<24x128xf32>
    %38 = tpu.matmul %37, %35, %cst_27 {dimension_numbers = #tpu.dot_dimension_numbers<[1], [0], [0], [1], [0, 0, 1, 1], [], []>} : vector<24x32xbf16>, vector<32x128xbf16>, vector<24x128xf32> -> vector<24x128xf32>
    %c4_28 = arith.constant 4 : index
    %c0_29 = arith.constant 0 : index
    %c0_30 = arith.constant 0 : index
    %39 = vector.load %arg3[%c4_28, %c0_29, %c0_30] : memref<6x40x1xf32, #tpu.memory_space<vmem>>, vector<1x24x1xf32>
    %40 = vector.shape_cast %39 : vector<1x24x1xf32> to vector<24x1xf32>
    %41 = vector.broadcast %40 : vector<24x1xf32> to vector<24x128xf32>
    %42 = arith.addf %38, %41 : vector<24x128xf32>
    %43 = arith.truncf %42 : vector<24x128xf32> to vector<24x128xbf16>
    %44 = math.tanh %43 : vector<24x128xbf16>
    %c5 = arith.constant 5 : index
    %c0_31 = arith.constant 0 : index
    %c0_32 = arith.constant 0 : index
    %45 = vector.load %arg2[%c5, %c0_31, %c0_32] : memref<6x40x40xbf16, #tpu.memory_space<vmem>>, vector<1x16x24xbf16>
    %46 = vector.shape_cast %45 : vector<1x16x24xbf16> to vector<16x24xbf16>
    %cst_33 = arith.constant dense<0.000000e+00> : vector<16x128xf32>
    %47 = tpu.matmul %46, %44, %cst_33 {dimension_numbers = #tpu.dot_dimension_numbers<[1], [0], [0], [1], [0, 0, 1, 1], [], []>} : vector<16x24xbf16>, vector<24x128xbf16>, vector<16x128xf32> -> vector<16x128xf32>
    %c5_34 = arith.constant 5 : index
    %c0_35 = arith.constant 0 : index
    %c0_36 = arith.constant 0 : index
    %48 = vector.load %arg3[%c5_34, %c0_35, %c0_36] : memref<6x40x1xf32, #tpu.memory_space<vmem>>, vector<1x16x1xf32>
    %49 = vector.shape_cast %48 : vector<1x16x1xf32> to vector<16x1xf32>
    %50 = vector.broadcast %49 : vector<16x1xf32> to vector<16x128xf32>
    %51 = arith.addf %47, %50 : vector<16x128xf32>
    %c0_37 = arith.constant 0 : index
    %c0_38 = arith.constant 0 : index
    %52 = vector.load %arg4[%c0_37, %c0_38] : memref<16x128xf32, #tpu.memory_space<vmem>>, vector<16x128xf32>
    tpu.vector_store %arg4[%c0_37, %c0_38], %51 {strides = array<i32>} : memref<16x128xf32, #tpu.memory_space<vmem>>, vector<16x128xf32>,
    return
  }
  func.func @transform_0(%arg0: i32) -> (i32, i32) {
    %c0_i32 = arith.constant 0 : i32
    %c0_i32_0 = arith.constant 0 : i32
    return %c0_i32, %arg0 : i32, i32
  }
  func.func @transform_1(%arg0: i32) -> (i32, i32, i32) {
    %c0_i32 = arith.constant 0 : i32
    %c0_i32_0 = arith.constant 0 : i32
    %c0_i32_1 = arith.constant 0 : i32
    %c0_i32_2 = arith.constant 0 : i32
    return %c0_i32, %c0_i32_0, %c0_i32_1 : i32, i32, i32
  }
  func.func @transform_2(%arg0: i32) -> (i32, i32, i32) {
    %c0_i32 = arith.constant 0 : i32
    %c0_i32_0 = arith.constant 0 : i32
    %c0_i32_1 = arith.constant 0 : i32
    %c0_i32_2 = arith.constant 0 : i32
    return %c0_i32, %c0_i32_0, %c0_i32_1 : i32, i32, i32
  }
  func.func @transform_3(%arg0: i32) -> (i32, i32) {
    %c0_i32 = arith.constant 0 : i32
    %c0_i32_0 = arith.constant 0 : i32
    return %c0_i32, %arg0 : i32, i32
  }
}

</mosaic_0001>

<bundles_post_ra>
// kernel: tpu_custom_call.1
= control target key start
LH: loop header
LB: loop body
LE: loop exit
PB: predicated region body
PF: predicated region fallthrough
CT: control target
= control target key end

     0   :  { %v623_v3 = vmov 0   ;;  %vm53_vm0 = vcmask 130048   ;;  %s763_s0 = inlined_call_operand.vmem [shape: bf16[16,128], index: 0, kind: input, shape index: {}]   ;;  %s764_s1 = inlined_call_operand.vmem [shape: bf16[6,40,40], index: 1, kind: input, shape index: {}]   ;;  %s765_s2 = inlined_call_operand.vmem [shape: f32[6,40,1], index: 2, kind: input, shape index: {}]   ;;  %s766_s3 = inlined_call_operand.hbm [shape: f32[16,128], index: 3, kind: output, shape index: {}]  }
   0x1   :  { %v23_v0 = vld [vmem:[%s765_s2 + $0x10] sm:$0xff]  ;;  %v22_v1 = vld [vmem:[%s765_s2 + $0x8] sm:$0xff]  ;;  %v551_v2 = vld [vmem:[%s763_s0] sm:$0xff]  ;;  %567 = vset.pattern.permute.xlu1 %v623_v3  ;;  %566 = vset.pattern.permute.xlu0 %v623_v3 }
   0x2   :  { %v20_v4 = vld [vmem:[%s764_s1 + $0x8] sm:$0xf]  ;;  %36 = vperm.xlu0 %566, %v23_v0   ;;  %31 = vperm.xlu1 %567, %v22_v1   ;;  %v552_v5 = vld [vmem:[%s764_s1] sm:$0xff] }
   0x3   :  { %v44_v6 = vunpack.c.l.b16 %v20_v4  ;;  %67 = vmatpush.bf16.msra.mxu0 %v551_v2  ;;  %561 = vmatpush.bf16.msra.mxu3 %v551_v2 }
   0x4   :  { %568 = vset.pattern.permute.xlu2 %v623_v3 }
   0x5   :  { %v46_v7 = vpack.c.b16 %v44_v6, %v44_v6 }
   0x6   :  { %8 = vsyncpa [#allocation3], 0  ;;  %471 = vmatmul.msk.bf16.vlgmr.msra.gmra.mxu0 %vm53_vm0, %v552_v5  ;;  %v479_v8 = vld [vmem:[%s765_s2 + $0x38] sm:$0xff]  ;;  %v21_v9 = vld [vmem:[%s765_s2] sm:$0xff]  ;;  %vm135_vm1 = vcmask 1043456   ;;  %vm128_vm2 = vcmask 195584  }
   0x7   :  { %472 = vmatmul.msk.bf16.vlgmr.msra.gmra.mxu3 %vm53_vm0, %v46_v7  ;;  %v500_v10 = vld [vmem:[%s765_s2 + $0x70] sm:$0xff]  ;;  %v499_v13 = vld [vmem:[%s765_s2 + $0x68] sm:$0xff]  ;;  %v517_v17 = vld [vmem:[%s765_s2 + $0x80] sm:$0xff]  ;;  %vm220_vm3 = vcmask 261120   ;;  %vm296_vm4 = vcmask 326656   ;;  %s624_s22 = smov [#allocation2]  }
   0x8   :  { %v478_v11 = vld [vmem:[%s765_s2 + $0x30] sm:$0xff]  ;;  %v518_v15 = vld [vmem:[%s765_s2 + $0x88] sm:$0xff]  ;;  %v480_v22 = vld [vmem:[%s765_s2 + $0x40] sm:$0xff]  ;;  %s449_s23 = sshll.u32 %s624_s22, 4  ;;  %s451_s26 = sshll.u32 %s766_s3, 4  ;;  %s450_s23 = int_to_ptr.vmem [resolvable:$true] %s449_s23  ;;  %s452_s26 = int_to_ptr.hbm [resolvable:$true] %s451_s26 }
   0x9   :  { %v496_v12 = vld [vmem:[%s765_s2 + $0x50] sm:$0xff]  ;;  %v544_v18 = vld [vmem:[%s765_s2 + $0xc8] sm:$0xff]  ;;  %115 = vperm.xlu2 %568, %v480_v22   ;;  %v498_v37 = vld [vmem:[%s765_s2 + $0x60] sm:$0xff]  ;;  %s626_s27 = smov 8  }
   0xa   :  { %110 = vperm.xlu1 %567, %v479_v8   ;;  %26 = vperm.xlu0 %566, %v21_v9   ;;  %v519_v14 = vld [vmem:[%s765_s2 + $0x90] sm:$0xff]  ;;  %v534_v19 = vld [vmem:[%s765_s2 + $0xa8] sm:$0xff]  ;;  %v497_v43 = vld [vmem:[%s765_s2 + $0x58] sm:$0xff] }
   0xb   :  { %v535_v16 = vld [vmem:[%s765_s2 + $0xb0] sm:$0xff]  ;;  %v477_v26 = vld [vmem:[%s765_s2 + $0x28] sm:$0xff]  ;;  %v516_v46 = vld [vmem:[%s765_s2 + $0x78] sm:$0xff] }
   0xc   :  { %v553_v45 = vld [vmem:[%s764_s1 + $0x14] sm:$0xff]  ;;  %v533_v47 = vld [vmem:[%s765_s2 + $0xa0] sm:$0xff] }
   0xd   :  { %v554_v48 = vld [vmem:[%s764_s1 + $0x1c] sm:$0xff]  ;;  %v545_v49 = vld [vmem:[%s765_s2 + $0xd0] sm:$0xff] }
  0x11   :  { %100 = vperm.xlu2 %568, %v477_v26  }
  0x12   :  { %204 = vperm.xlu1 %567, %v500_v10   ;;  %105 = vperm.xlu0 %566, %v478_v11   ;;  %v555_v10 = vld [vmem:[%s764_s1 + $0x28] sm:$0xff]  ;;  %v556_v11 = vld [vmem:[%s764_s1 + $0x30] sm:$0xff] }
  0x19   :  { %194 = vperm.xlu2 %568, %v498_v37  }
  0x1a   :  { %184 = vperm.xlu1 %567, %v496_v12   ;;  %199 = vperm.xlu0 %566, %v499_v13   ;;  %v495_v12 = vld [vmem:[%s764_s1 + $0x38] sm:$0xf] }
  0x1b   :  { %v216_v13 = vunpack.c.l.b16 %v495_v12 }
  0x21   :  { %189 = vperm.xlu2 %568, %v497_v43  }
  0x22   :  { %283 = vperm.xlu1 %567, %v519_v14   ;;  %278 = vperm.xlu0 %566, %v518_v15   ;;  %v219_v14 = vpack.c.b16 %v216_v13, %v216_v13 }
  0x29   :  { %268 = vperm.xlu2 %568, %v516_v46  }
  0x2a   :  { %357 = vperm.xlu1 %567, %v535_v16   ;;  %273 = vperm.xlu0 %566, %v517_v17  }
  0x31   :  { %347 = vperm.xlu2 %568, %v533_v47  }
  0x32   :  { %410 = vperm.xlu1 %567, %v544_v18   ;;  %352 = vperm.xlu0 %566, %v534_v19  }
  0x39   :  { %415 = vperm.xlu2 %568, %v545_v49  }
  0x63   :  { %v116_v52 = vpop.permute.xlu2 %115 }
  0x6b   :  { %v101_v56 = vpop.permute.xlu2 %100 }
  0x73   :  { %v195_v19 = vpop.permute.xlu2 %194 }
  0x74   :  { %v37_v20 = vpop.permute.xlu0 %36  ;;  %v32_v24 = vpop.permute.xlu1 %31 }
  0x7c   :  { %v27_v27 = vpop.permute.xlu0 %26  ;;  %v111_v58 = vpop.permute.xlu1 %110 }
  0x83   :  { %v69_v21 = vpop.f32.mrf.mxu0 }
  0x84   :  { %v70_v29 = vadd.f32 %v69_v21, %v27_v27  ;;  %v106_v54 = vpop.permute.xlu0 %105 }
  0x8a   :  { %v74_v23 = vpop.f32.mrf.mxu3 }
  0x8b   :  { %v75_v25 = vadd.f32 %v74_v23, %v37_v20  ;;  %v71_v28 = vpop.f32.mrf.mxu0  ;;  %v205_v20 = vpop.permute.xlu1 %204 }
  0x8c   :  { %v72_v31 = vadd.f32 %v71_v28, %v32_v24  ;;  %v200_v23 = vpop.permute.xlu0 %199  ;;  %v190_v28 = vpop.permute.xlu2 %189 }
  0x8d   :  { %v79_v30 = vpack.c.bf16 %v75_v25, %v75_v25 }
  0x8e   :  { %v78_v33 = vpack.c.bf16 %v72_v31, %v70_v29 }
  0x8f   :  { %v82_v32 = vunpack.c.l.bf16 %v79_v30 }
  0x90   :  { %v80_v34 = vunpack.c.l.bf16 %v78_v33  ;;  %v81_v35 = vunpack.c.h.bf16 %v78_v33 }
  0x91   :  { %569 = vtanh.f32 %v82_v32 }
  0x92   :  { %v76_v36 = vpop.f32.mrf.mxu3  ;;  %571 = vtanh.f32 %v80_v34 }
  0x93   :  { %573 = vtanh.f32 %v81_v35  ;;  %v185_v32 = vpop.permute.xlu1 %184  ;;  %v557_v35 = vld [vmem:[%s764_s1 + $0x3c] sm:$0xff]  ;;  %v558_v36 = vld [vmem:[%s764_s1 + $0x44] sm:$0xff] }
  0x94   :  { %v269_v43 = vpop.permute.xlu2 %268 }
  0x97   :  { %v570_v38 = vpop.eup %569 }
  0x98   :  { %v87_v39 = vpack.c.bf16 %v570_v38, %v570_v38  ;;  %v572_v40 = vpop.eup %571 }
  0x99   :  { %v574_v41 = vpop.eup %573 }
  0x9a   :  { %v137_v42 = vsel %vm135_vm1, %v87_v39, 0  ;;  %v86_v44 = vpack.c.bf16 %v574_v41, %v572_v40  ;;  %v279_v39 = vpop.permute.xlu0 %278 }
  0x9b   :  { %145 = vmatpush.bf16.msra.mxu1 %v137_v42 }
  0x9f   :  { %146 = vmatpush.bf16.msra.mxu1 %v86_v44 }
  0xa2   :  { %489 = vmatmul.msk.bf16.vlgmr.msra.gmra.mxu1 %vm128_vm2, %v553_v45  ;;  %v274_v41 = vpop.permute.xlu0 %273  ;;  %v284_v45 = vpop.permute.xlu1 %283 }
  0xb2   :  { %490 = vmatmul.msk.bf16.gmra.mxu1 %vm128_vm2, %v554_v48 }
 0x11f   :  { %v148_v50 = vpop.f32.mrf.mxu1 }
 0x120   :  { %v149_v57 = vadd.f32 %v148_v50, %v101_v56 }
 0x127   :  { %v150_v51 = vpop.f32.mrf.mxu1 }
 0x128   :  { %v151_v55 = vadd.f32 %v150_v51, %v106_v54 }
 0x12a   :  { %v158_v60 = vpack.c.bf16 %v151_v55, %v149_v57 }
 0x12c   :  { %v160_v0 = vunpack.c.l.bf16 %v158_v60  ;;  %v161_v3 = vunpack.c.h.bf16 %v158_v60 }
 0x12f   :  { %v153_v53 = vpop.f32.mrf.mxu1 }
 0x130   :  { %v154_v61 = vadd.f32 %v153_v53, %v111_v58 }
 0x137   :  { %v155_v59 = vpop.f32.mrf.mxu1 }
 0x138   :  { %v156_v62 = vadd.f32 %v155_v59, %v116_v52 }
 0x13a   :  { %v159_v63 = vpack.c.bf16 %v156_v62, %v154_v61  ;;  %v559_v61 = vld [vmem:[%s764_s1 + $0x50] sm:$0xff]  ;;  %v532_v62 = vld [vmem:[%s764_s1 + $0x58] sm:$0xf] }
 0x13c   :  { %v162_v1 = vunpack.c.l.bf16 %v159_v63  ;;  %v163_v2 = vunpack.c.h.bf16 %v159_v63  ;;  %v365_v63 = vunpack.c.l.b16 %v532_v62 }
 0x13e   :  { %575 = vtanh.f32 %v162_v1 }
 0x13f   :  { %577 = vtanh.f32 %v163_v2 }
 0x140   :  { %579 = vtanh.f32 %v160_v0  ;;  %v367_v0 = vpack.c.b16 %v365_v63, %v365_v63 }
 0x141   :  { %581 = vtanh.f32 %v161_v3  ;;  %v353_v3 = vpop.permute.xlu0 %352 }
 0x144   :  { %v576_v4 = vpop.eup %575 }
 0x145   :  { %v578_v5 = vpop.eup %577 }
 0x146   :  { %v580_v6 = vpop.eup %579  ;;  %v169_v7 = vpack.c.bf16 %v578_v5, %v576_v4  ;;  %v348_v5 = vpop.permute.xlu2 %347 }
 0x147   :  { %v582_v8 = vpop.eup %581 }
 0x148   :  { %236 = vmatpush.bf16.msra.mxu2 %v169_v7  ;;  %v168_v9 = vpack.c.bf16 %v582_v8, %v580_v6  ;;  %v358_v7 = vpop.permute.xlu1 %357 }
 0x14c   :  { %237 = vmatpush.bf16.msra.mxu2 %v168_v9 }
 0x14f   :  { %509 = vmatmul.msk.bf16.vlgmr.msra.gmra.mxu2 %vm220_vm3, %v555_v10 }
 0x15f   :  { %510 = vmatmul.msk.bf16.gmra.mxu2 %vm220_vm3, %v556_v11 }
 0x16f   :  { %511 = vmatmul.msk.bf16.gmra.mxu2 %vm220_vm3, %v219_v14 }
 0x1d2   :  { %v239_v15 = vpop.f32.mrf.mxu2 }
 0x1d3   :  { %v240_v33 = vadd.f32 %v239_v15, %v185_v32 }
 0x1da   :  { %v241_v16 = vpop.f32.mrf.mxu2 }
 0x1db   :  { %v242_v29 = vadd.f32 %v241_v16, %v190_v28 }
 0x1dd   :  { %v253_v34 = vpack.c.bf16 %v242_v29, %v240_v33 }
 0x1e2   :  { %v244_v17 = vpop.f32.mrf.mxu2 }
 0x1e3   :  { %v245_v27 = vadd.f32 %v244_v17, %v195_v19 }
 0x1ea   :  { %v246_v18 = vpop.f32.mrf.mxu2 }
 0x1eb   :  { %v247_v25 = vadd.f32 %v246_v18, %v200_v23  ;;  %v411_v23 = vpop.permute.xlu1 %410 }
 0x1ed   :  { %v254_v31 = vpack.c.bf16 %v247_v25, %v245_v27 }
 0x1f2   :  { %v249_v21 = vpop.f32.mrf.mxu2 }
 0x1f3   :  { %v250_v22 = vadd.f32 %v249_v21, %v205_v20 }
 0x1f5   :  { %v255_v24 = vpack.c.bf16 %v250_v22, %v250_v22  ;;  %v560_v22 = vld [vmem:[%s764_s1 + $0x64] sm:$0xff]  ;;  %s625_s1 = smov 128  }
 0x1f7   :  { %v304_v26 = vsel %vm135_vm1, %v255_v24, 0 }
 0x1f8   :  { %311 = vmatpush.bf16.msrb.mxu3 %v304_v26  ;;  %v416_v26 = vpop.permute.xlu2 %415 }
 0x1fa   :  { %v251_v30 = vpop.f32.mrf.mxu2 }
 0x1fc   :  { %312 = vmatpush.bf16.msrb.mxu3 %v254_v31 }
 0x200   :  { %313 = vmatpush.bf16.msrb.mxu3 %v253_v34 }
 0x203   :  { %528 = vmatmul.msk.bf16.vlgmr.msrb.gmra.mxu3 %vm296_vm4, %v557_v35 }
 0x213   :  { %529 = vmatmul.msk.bf16.gmra.mxu3 %vm296_vm4, %v558_v36 }
 0x286   :  { %v315_v37 = vpop.f32.mrf.mxu3 }
 0x287   :  { %v316_v44 = vadd.f32 %v315_v37, %v269_v43 }
 0x28e   :  { %v317_v38 = vpop.f32.mrf.mxu3 }
 0x28f   :  { %v318_v42 = vadd.f32 %v317_v38, %v274_v41 }
 0x291   :  { %v325_v47 = vpack.c.bf16 %v318_v42, %v316_v44 }
 0x293   :  { %v327_v51 = vunpack.c.l.bf16 %v325_v47  ;;  %v328_v54 = vunpack.c.h.bf16 %v325_v47 }
 0x296   :  { %v320_v40 = vpop.f32.mrf.mxu3 }
 0x297   :  { %v321_v48 = vadd.f32 %v320_v40, %v279_v39 }
 0x29e   :  { %v322_v46 = vpop.f32.mrf.mxu3 }
 0x29f   :  { %v323_v49 = vadd.f32 %v322_v46, %v284_v45 }
 0x2a1   :  { %v326_v50 = vpack.c.bf16 %v323_v49, %v321_v48 }
 0x2a3   :  { %v329_v52 = vunpack.c.l.bf16 %v326_v50  ;;  %v330_v53 = vunpack.c.h.bf16 %v326_v50 }
 0x2a5   :  { %583 = vtanh.f32 %v329_v52 }
 0x2a6   :  { %585 = vtanh.f32 %v330_v53 }
 0x2a7   :  { %587 = vtanh.f32 %v327_v51 }
 0x2a8   :  { %589 = vtanh.f32 %v328_v54 }
 0x2ab   :  { %v584_v55 = vpop.eup %583 }
 0x2ac   :  { %v586_v56 = vpop.eup %585 }
 0x2ad   :  { %v588_v57 = vpop.eup %587  ;;  %v336_v58 = vpack.c.bf16 %v586_v56, %v584_v55 }
 0x2ae   :  { %v590_v59 = vpop.eup %589 }
 0x2af   :  { %380 = vmatpush.bf16.msrb.mxu0 %v336_v58  ;;  %v335_v60 = vpack.c.bf16 %v590_v59, %v588_v57 }
 0x2b3   :  { %381 = vmatpush.bf16.msrb.mxu0 %v335_v60 }
 0x2b6   :  { %540 = vmatmul.msk.bf16.vlgmr.msrb.gmra.mxu0 %vm220_vm3, %v559_v61 }
 0x2c6   :  { %541 = vmatmul.msk.bf16.gmra.mxu0 %vm220_vm3, %v367_v0 }
 0x333   :  { %v383_v1 = vpop.f32.mrf.mxu0 }
 0x334   :  { %v384_v6 = vadd.f32 %v383_v1, %v348_v5 }
 0x33b   :  { %v385_v2 = vpop.f32.mrf.mxu0 }
 0x33c   :  { %v386_v4 = vadd.f32 %v385_v2, %v353_v3 }
 0x33e   :  { %v392_v9 = vpack.c.bf16 %v386_v4, %v384_v6 }
 0x340   :  { %v394_v12 = vunpack.c.l.bf16 %v392_v9  ;;  %v395_v14 = vunpack.c.h.bf16 %v392_v9 }
 0x343   :  { %v388_v8 = vpop.f32.mrf.mxu0 }
 0x344   :  { %v389_v10 = vadd.f32 %v388_v8, %v358_v7 }
 0x346   :  { %v393_v11 = vpack.c.bf16 %v389_v10, %v389_v10 }
 0x348   :  { %v396_v13 = vunpack.c.l.bf16 %v393_v11 }
 0x34a   :  { %591 = vtanh.f32 %v396_v13 }
 0x34b   :  { %v390_v15 = vpop.f32.mrf.mxu0  ;;  %593 = vtanh.f32 %v394_v12 }
 0x34c   :  { %595 = vtanh.f32 %v395_v14 }
 0x350   :  { %v592_v16 = vpop.eup %591 }
 0x351   :  { %v401_v17 = vpack.c.bf16 %v592_v16, %v592_v16  ;;  %v594_v18 = vpop.eup %593 }
 0x352   :  { %v596_v19 = vpop.eup %595 }
 0x353   :  { %v427_v20 = vsel %vm135_vm1, %v401_v17, 0  ;;  %v400_v21 = vpack.c.bf16 %v596_v19, %v594_v18 }
 0x354   :  { %435 = vmatpush.bf16.msrb.mxu1 %v427_v20 }
 0x358   :  { %436 = vmatpush.bf16.msrb.mxu1 %v400_v21 }
 0x35b   :  { %550 = vmatmul.msk.bf16.vlgmr.msrb.gmra.mxu1 %vm128_vm2, %v560_v22 }
 0x3d8   :  { %v438_v24 = vpop.f32.mrf.mxu1 }
 0x3d9   :  { %v439_v25 = vadd.f32 %v438_v24, %v411_v23 }
 0x3db   :  { %443 = vst [vmem:[#allocation2] sm:$0xff] %v439_v25 }
 0x3e0   :  { %v440_v27 = vpop.f32.mrf.mxu1 }
 0x3e1   :  { %v441_v28 = vadd.f32 %v440_v27, %v416_v26 }
 0x3e3   :  { %444 = vst [vmem:[#allocation2 + $0x8] sm:$0xff] %v441_v28 }
 0x3e4   :  { %457 = dma.vmem_to_hbm [thread:$0]  %s450_s23, 256, %s452_s26, [#allocation3], %s625_s1, %s625_s1, %s626_s27  }
 0x3e5   :  { %621 = dma.done.wait [#allocation3], 256  }
 0x3e6   :  { %622 = vsyncadd [#allocation3], 4294967040 }
 0x3e7   :  { %462 = vsyncpa [#allocation3], 1 }

</bundles_post_ra>
